<compile_context>
chip_gen: v7x
topology: tpu7x:2x2x1
jax: 0.10.0
libtpu: 0.0.40
codegen_flags: <defaults>
</compile_context>

<pallas_src>
import functools

import jax
import jax.numpy as jnp
from jax.experimental import pallas as pl
from jax.experimental.pallas import tpu as pltpu

# ---------------- model dims (small, consistent with the module) ----------------
VOCAB = 100
VOCAB_PAD = 128   # lane-aligned padded vocab for the in-kernel one-hot gather
E = 32            # word embedding dim
KS = 3            # DocNN conv kernel size
H_DOC = 64        # doc encoder output dim
N_INTENT = 8      # number of intents == len_intent
H_SLOT = 64       # slot encoder output dim
N_SLOT = 9        # number of slot labels
B, S = 2, 8       # batch, sequence length

LANES = 128       # lane width of the packed f32 slab and the output slab

# fused matmul weight layout: [tap0 | tap1 | tap2 | slot_enc_w] along the lane axis
W_CAT_COLS = 3 * H_DOC + H_SLOT            # 256

# packed f32 decoder/bias slab row layout (all block starts 8-aligned)
ROW_DDEC = 0                               # rows [0,   64): doc_dec_w  (H_DOC, N_INTENT) lane-padded
ROW_WWORD = H_DOC                          # rows [64, 128): slot_dec_w word part (H_SLOT, N_SLOT) lane-padded
ROW_WINT = 2 * H_DOC                       # rows [128,136): slot_dec_w intent part (N_INTENT, N_SLOT) lane-padded
ROW_BIAS = ROW_WINT + ((N_INTENT + 7) // 8) * 8   # rows [136,144): bias block
SLAB_ROWS = ROW_BIAS + 8                   # 144


# ---------------- the single fused Pallas kernel --------------------------------
def _intent_slot_kernel(tok_ref, emb_ref, wcat_ref, slab_ref, out_ref, *, batch, seq):
    f32 = jnp.float32
    bf16 = jnp.bfloat16
    BS = batch * seq
    Vp = emb_ref.shape[0]

    # --- 1) embedding lookup: one_hot(tokens) @ table on the MXU (exact for one-hot)
    tok = tok_ref[...]                                                    # (BS, 1) int32
    vocab_iota = jax.lax.broadcasted_iota(jnp.int32, (BS, Vp), 1)
    onehot_tok = (vocab_iota == tok).astype(bf16)                         # (BS, Vp)
    emb = jnp.dot(onehot_tok, emb_ref[...],
                  preferred_element_type=f32).astype(bf16)                # (BS, E) bf16 (exact rows)

    # --- 2) ONE fused matmul for doc-conv taps 0/1/2 and the slot encoder
    ycat = jnp.dot(emb, wcat_ref[...], preferred_element_type=f32)        # (BS, 256) f32
    y0 = ycat[:, 0:H_DOC]                   # applied to emb[t-1]
    y1 = ycat[:, H_DOC:2 * H_DOC]           # applied to emb[t]
    y2 = ycat[:, 2 * H_DOC:3 * H_DOC]       # applied to emb[t+1]
    word_pre = ycat[:, 3 * H_DOC:3 * H_DOC + H_SLOT]                      # slot-encoder pre-activation

    # --- packed decoder weights / biases (static, 8-aligned sublane slices)
    ddec_w = slab_ref[ROW_DDEC:ROW_DDEC + H_DOC, :]                       # (H_DOC, 128)
    w_word = slab_ref[ROW_WWORD:ROW_WWORD + H_SLOT, :]                    # (H_SLOT, 128)
    w_int = slab_ref[ROW_WINT:ROW_WINT + N_INTENT, :]                     # (N_INTENT, 128)
    biases = slab_ref[ROW_BIAS:ROW_BIAS + 8, :]                           # (8, 128)
    doc_b = biases[0:1, 0:H_DOC]                                          # (1, H_DOC)
    slot_b = biases[1:2, 0:H_SLOT]                                        # (1, H_SLOT)
    ddec_b = biases[2:3, :]                                               # (1, 128), cols >= N_INTENT are 0
    sdec_b = biases[3:4, :]                                               # (1, 128), cols >= N_SLOT  are 0

    # --- conv1d k=3 'same' within each sentence: XLU sublane rolls + boundary masks
    t = jax.lax.broadcasted_iota(jnp.int32, (BS, 1), 0) % seq             # position within sentence
    prev_ok = (t > 0).astype(f32)                                         # zero-pad at sentence start
    next_ok = (t < seq - 1).astype(f32)                                   # zero-pad at sentence end
    y_prev = pltpu.roll(y0, shift=1, axis=0)          # row r <- y0[r-1]  (wraparound masked)
    y_next = pltpu.roll(y2, shift=BS - 1, axis=0)     # row r <- y2[r+1]  (== shift -1, wrap masked)
    conv = jnp.maximum(prev_ok * y_prev + y1 + next_ok * y_next + doc_b, 0.0)   # (BS, H_DOC)

    # --- max-over-time per sentence (layout-preserving reshape, XLU reduce)
    sent_enc = jnp.max(conv.reshape(batch, seq, H_DOC), axis=1)           # (B, H_DOC)

    # --- slot encoder: centre-tap Linear + ReLU (DocNN on a length-1 zero-padded word)
    word_enc = jnp.maximum(word_pre + slot_b, 0.0)                        # (BS, H_SLOT)

    # --- doc decoder -> intent logits (lane-padded to 128; cols >= N_INTENT are 0)
    intent = jnp.dot(sent_enc, ddec_w, preferred_element_type=f32) + ddec_b   # (B, 128)
    out_ref[BS:BS + batch, :] = intent

    # --- head.get_results: argmax (first max) -> one-hot; one-hot @ W_int == row select
    logits = intent[:, 0:N_INTENT]                                        # (B, N_INTENT)
    lane = jax.lax.broadcasted_iota(jnp.int32, (batch, N_INTENT), 1)
    mmax = jnp.max(logits, axis=-1, keepdims=True)
    amax = jnp.min(jnp.where(logits == mmax, lane, N_INTENT), axis=-1, keepdims=True)
    onehot_int = (lane == amax).astype(f32)                               # (B, N_INTENT)
    int_contrib = jnp.dot(onehot_int, w_int, preferred_element_type=f32)  # (B, 128)

    # --- broadcast the sentence-level contribution to every word (sublane broadcast)
    word_int = jnp.broadcast_to(int_contrib[:, None, :],
                                (batch, seq, LANES)).reshape(BS, LANES)   # (BS, 128)

    # --- slot decoder (lane-dense (BS,128) store; cols >= N_SLOT are garbage-free zeros+bias pad)
    slots = jnp.dot(word_enc, w_word, preferred_element_type=f32) + word_int + sdec_b
    out_ref[0:BS, :] = slots


# ---------------- parameters (deterministic synthetic init) ---------------------
def init_params(key):
    ks = jax.random.split(key, 8)

    def lin(k, fan_in, shape):
        return jax.random.normal(k, shape, jnp.float32) / jnp.sqrt(float(fan_in))

    return {
        # WordEmbedding
        "embedding": jax.random.normal(ks[0], (VOCAB, E), jnp.float32) * 0.1,
        # DocNNEncoder for sentences (conv weight in im2col layout [KS*E, H_DOC], taps [t-1|t|t+1])
        "doc_enc_w": lin(ks[1], KS * E, (KS * E, H_DOC)),
        "doc_enc_b": jnp.zeros((H_DOC,), jnp.float32),
        # DocNNEncoder for single words: only the centre conv tap matters -> [E, H_SLOT]
        "slot_enc_w": lin(ks[2], E, (E, H_SLOT)),
        "slot_enc_b": jnp.zeros((H_SLOT,), jnp.float32),
        # MLPDecoder (doc): Linear H_DOC -> N_INTENT
        "doc_dec_w": lin(ks[3], H_DOC, (H_DOC, N_INTENT)),
        "doc_dec_b": lin(ks[4], H_DOC, (N_INTENT,)),
        # MLPDecoder (slot): Linear (H_SLOT + len_intent) -> N_SLOT
        "slot_dec_w": lin(ks[5], H_SLOT + N_INTENT, (H_SLOT + N_INTENT, N_SLOT)),
        "slot_dec_b": lin(ks[6], H_SLOT + N_INTENT, (N_SLOT,)),
    }


def pack_params(params):
    """One-time host-side packing into lane-dense slabs (called once, outside jit)."""
    f32 = jnp.float32

    # padded embedding table (bf16): vocab axis padded to 128
    emb_pad = jnp.zeros((VOCAB_PAD, E), f32).at[:VOCAB].set(params["embedding"])
    emb_pad = emb_pad.astype(jnp.bfloat16)

    # fused matmul weight: [doc tap0 | doc tap1 | doc tap2 | slot_enc_w] -> (E, 256) bf16
    w_cat = jnp.concatenate(
        [params["doc_enc_w"][0 * E:1 * E],
         params["doc_enc_w"][1 * E:2 * E],
         params["doc_enc_w"][2 * E:3 * E],
         params["slot_enc_w"]], axis=1).astype(jnp.bfloat16)              # (E, W_CAT_COLS)

    # decoder weights + all biases packed into one 128-lane f32 slab
    slab = jnp.zeros((SLAB_ROWS, LANES), f32)
    slab = slab.at[ROW_DDEC:ROW_DDEC + H_DOC, :N_INTENT].set(params["doc_dec_w"])
    slab = slab.at[ROW_WWORD:ROW_WWORD + H_SLOT, :N_SLOT].set(params["slot_dec_w"][:H_SLOT])
    slab = slab.at[ROW_WINT:ROW_WINT + N_INTENT, :N_SLOT].set(params["slot_dec_w"][H_SLOT:])
    slab = slab.at[ROW_BIAS + 0, :H_DOC].set(params["doc_enc_b"])
    slab = slab.at[ROW_BIAS + 1, :H_SLOT].set(params["slot_enc_b"])
    slab = slab.at[ROW_BIAS + 2, :N_INTENT].set(params["doc_dec_b"])
    slab = slab.at[ROW_BIAS + 3, :N_SLOT].set(params["slot_dec_b"])

    return {"emb": emb_pad, "w_cat": w_cat, "slab": slab}


# ---------------- forward: one fused, gridless pallas_call ----------------------
def forward(packed, token_ids):
    if token_ids.ndim == 1:
        token_ids = token_ids[None, :]
    Bx, Sx = token_ids.shape
    BS = Bx * Sx
    out_rows = ((BS + Bx + 7) // 8) * 8      # slots rows [0,BS), intent rows [BS,BS+Bx)

    tok = token_ids.reshape(BS, 1).astype(jnp.int32)

    out = pl.pallas_call(
        functools.partial(_intent_slot_kernel, batch=Bx, seq=Sx),
        out_shape=jax.ShapeDtypeStruct((out_rows, LANES), jnp.float32),
        # no grid / no BlockSpecs: single invocation, every operand fully VMEM-resident
    )(tok, packed["emb"], packed["w_cat"], packed["slab"])

    slots_batch = out[:BS, :N_SLOT]
    intent_batch = out[BS:BS + Bx, :N_INTENT]
    return intent_batch, slots_batch


if __name__ == "__main__":
    key = jax.random.PRNGKey(0)
    pkey, tkey = jax.random.split(key)
    params = init_params(pkey)
    packed = pack_params(params)                       # one-time packing, outside jit
    token_ids = jax.random.randint(tkey, (B, S), 0, VOCAB, dtype=jnp.int32)

    fwd = jax.jit(forward)
    intent_batch, slots_batch = fwd(packed, token_ids)
    jax.block_until_ready((intent_batch, slots_batch))

    assert intent_batch.shape == (B, N_INTENT)
    assert slots_batch.shape == (B * S, N_SLOT)
    assert bool(jnp.all(jnp.isfinite(intent_batch)))
    assert bool(jnp.all(jnp.isfinite(slots_batch)))
    print("KERNEL_OK")
</pallas_src>

<mosaic_0001>
module attributes {stable_mosaic.version = 11 : i64} {
  func.func @_intent_slot_kernel(%arg0: memref<16x1xi32, #tpu.memory_space<vmem>>, %arg1: memref<128x32xbf16, #tpu.memory_space<vmem>>, %arg2: memref<32x256xbf16, #tpu.memory_space<vmem>>, %arg3: memref<144x128xf32, #tpu.memory_space<vmem>>, %arg4: memref<24x128xf32, #tpu.memory_space<vmem>>) attributes {dimension_semantics = [], scalar_prefetch = 0 : i64, scratch_operands = 0 : i64, tpu.core_type = #tpu.core_type<tc>} {
    %c0 = arith.constant 0 : index
    %c0_0 = arith.constant 0 : index
    %0 = vector.load %arg0[%c0, %c0_0] : memref<16x1xi32, #tpu.memory_space<vmem>>, vector<16x1xi32>
    %1 = tpu.iota {dimensions = array<i32: 1>} : vector<16x128xi32>
    %2 = vector.broadcast %0 : vector<16x1xi32> to vector<16x128xi32>
    %3 = arith.cmpi eq, %1, %2 : vector<16x128xi32>
    %4 = arith.extui %3 : vector<16x128xi1> to vector<16x128xi32>
    %5 = arith.sitofp %4 : vector<16x128xi32> to vector<16x128xf32>
    %6 = arith.truncf %5 : vector<16x128xf32> to vector<16x128xbf16>
    %c0_1 = arith.constant 0 : index
    %c0_2 = arith.constant 0 : index
    %7 = vector.load %arg1[%c0_1, %c0_2] : memref<128x32xbf16, #tpu.memory_space<vmem>>, vector<128x32xbf16>
    %cst = arith.constant dense<0.000000e+00> : vector<16x32xf32>
    %8 = tpu.matmul %6, %7, %cst {dimension_numbers = #tpu.dot_dimension_numbers<[1], [0], [0], [1], [0, 0, 1, 1], [], []>} : vector<16x128xbf16>, vector<128x32xbf16>, vector<16x32xf32> -> vector<16x32xf32>
    %9 = arith.truncf %8 : vector<16x32xf32> to vector<16x32xbf16>
    %c0_3 = arith.constant 0 : index
    %c0_4 = arith.constant 0 : index
    %10 = vector.load %arg2[%c0_3, %c0_4] : memref<32x256xbf16, #tpu.memory_space<vmem>>, vector<32x256xbf16>
    %cst_5 = arith.constant dense<0.000000e+00> : vector<16x256xf32>
    %11 = tpu.matmul %9, %10, %cst_5 {dimension_numbers = #tpu.dot_dimension_numbers<[1], [0], [0], [1], [0, 0, 1, 1], [], []>} : vector<16x32xbf16>, vector<32x256xbf16>, vector<16x256xf32> -> vector<16x256xf32>
    %12 = vector.extract_strided_slice %11 {offsets = [0, 0], sizes = [16, 64], strides = [1, 1]} : vector<16x256xf32> to vector<16x64xf32>
    %13 = vector.extract_strided_slice %11 {offsets = [0, 64], sizes = [16, 64], strides = [1, 1]} : vector<16x256xf32> to vector<16x64xf32>
    %14 = vector.extract_strided_slice %11 {offsets = [0, 128], sizes = [16, 64], strides = [1, 1]} : vector<16x256xf32> to vector<16x64xf32>
    %15 = vector.extract_strided_slice %11 {offsets = [0, 192], sizes = [16, 64], strides = [1, 1]} : vector<16x256xf32> to vector<16x64xf32>
    %c0_6 = arith.constant 0 : index
    %c0_7 = arith.constant 0 : index
    %16 = vector.load %arg3[%c0_6, %c0_7] : memref<144x128xf32, #tpu.memory_space<vmem>>, vector<64x128xf32>
    %c64 = arith.constant 64 : index
    %c0_8 = arith.constant 0 : index
    %17 = vector.load %arg3[%c64, %c0_8] : memref<144x128xf32, #tpu.memory_space<vmem>>, vector<64x128xf32>
    %c128 = arith.constant 128 : index
    %c0_9 = arith.constant 0 : index
    %18 = vector.load %arg3[%c128, %c0_9] : memref<144x128xf32, #tpu.memory_space<vmem>>, vector<8x128xf32>
    %c136 = arith.constant 136 : index
    %c0_10 = arith.constant 0 : index
    %19 = vector.load %arg3[%c136, %c0_10] : memref<144x128xf32, #tpu.memory_space<vmem>>, vector<8x128xf32>
    %20 = vector.extract_strided_slice %19 {offsets = [0, 0], sizes = [1, 64], strides = [1, 1]} : vector<8x128xf32> to vector<1x64xf32>
    %21 = vector.extract_strided_slice %19 {offsets = [1, 0], sizes = [1, 64], strides = [1, 1]} : vector<8x128xf32> to vector<1x64xf32>
    %22 = vector.extract_strided_slice %19 {offsets = [2, 0], sizes = [1, 128], strides = [1, 1]} : vector<8x128xf32> to vector<1x128xf32>
    %23 = vector.extract_strided_slice %19 {offsets = [3, 0], sizes = [1, 128], strides = [1, 1]} : vector<8x128xf32> to vector<1x128xf32>
    %24 = tpu.iota {dimensions = array<i32: 0>} : vector<16x1xi32>
    %c8_i32 = arith.constant 8 : i32
    %c0_i32 = arith.constant 0 : i32
    %25 = arith.cmpi eq, %c8_i32, %c0_i32 : i32
    %c1_i32 = arith.constant 1 : i32
    %26 = arith.select %25, %c1_i32, %c8_i32 : i32
    %27 = vector.broadcast %26 : i32 to vector<16x1xi32>
    %28 = arith.remsi %24, %27 : vector<16x1xi32>
    %c0_i32_11 = arith.constant 0 : i32
    %29 = vector.broadcast %c0_i32_11 : i32 to vector<16x1xi32>
    %30 = arith.cmpi ne, %28, %29 : vector<16x1xi32>
    %c0_i32_12 = arith.constant 0 : i32
    %31 = vector.broadcast %c0_i32_12 : i32 to vector<16x1xi32>
    %32 = arith.cmpi slt, %28, %31 : vector<16x1xi32>
    %c0_i32_13 = arith.constant 0 : i32
    %33 = arith.cmpi slt, %26, %c0_i32_13 : i32
    %34 = vector.broadcast %33 : i1 to vector<16x1xi1>
    %35 = vector.broadcast %34 : vector<16x1xi1> to vector<16x1xi1>
    %36 = arith.xori %32, %35 : vector<16x1xi1>
    %37 = arith.andi %36, %30 : vector<16x1xi1>
    %38 = vector.broadcast %26 : i32 to vector<16x1xi32>
    %39 = arith.addi %28, %38 : vector<16x1xi32>
    %40 = arith.select %37, %39, %28 : vector<16x1xi1>, vector<16x1xi32>
    %c0_i32_14 = arith.constant 0 : i32
    %41 = vector.broadcast %c0_i32_14 : i32 to vector<16x1xi32>
    %42 = arith.cmpi sgt, %40, %41 : vector<16x1xi32>
    %43 = arith.extui %42 : vector<16x1xi1> to vector<16x1xi32>
    %44 = arith.sitofp %43 : vector<16x1xi32> to vector<16x1xf32>
    %c7_i32 = arith.constant 7 : i32
    %45 = vector.broadcast %c7_i32 : i32 to vector<16x1xi32>
    %46 = arith.cmpi slt, %40, %45 : vector<16x1xi32>
    %47 = arith.extui %46 : vector<16x1xi1> to vector<16x1xi32>
    %48 = arith.sitofp %47 : vector<16x1xi32> to vector<16x1xf32>
    %c1_i32_15 = arith.constant 1 : i32
    %49 = tpu.dynamic_rotate %12 by %c1_i32_15 dim 0 : vector<16x64xf32>, i32 -> vector<16x64xf32>
    %c15_i32 = arith.constant 15 : i32
    %50 = tpu.dynamic_rotate %14 by %c15_i32 dim 0 : vector<16x64xf32>, i32 -> vector<16x64xf32>
    %51 = vector.broadcast %44 : vector<16x1xf32> to vector<16x64xf32>
    %52 = arith.mulf %51, %49 : vector<16x64xf32>
    %53 = arith.addf %52, %13 : vector<16x64xf32>
    %54 = vector.broadcast %48 : vector<16x1xf32> to vector<16x64xf32>
    %55 = arith.mulf %54, %50 : vector<16x64xf32>
    %56 = arith.addf %53, %55 : vector<16x64xf32>
    %57 = vector.broadcast %20 : vector<1x64xf32> to vector<16x64xf32>
    %58 = arith.addf %56, %57 : vector<16x64xf32>
    %cst_16 = arith.constant 0.000000e+00 : f32
    %59 = vector.broadcast %cst_16 : f32 to vector<16x64xf32>
    %60 = arith.maximumf %58, %59 : vector<16x64xf32>
    %61 = vector.shape_cast %60 : vector<16x64xf32> to vector<2x8x64xf32>
    %cst_17 = arith.constant dense<0xFF800000> : vector<2x64xf32>
    %62 = vector.multi_reduction <maximumf>, %61, %cst_17 [1] : vector<2x8x64xf32> to vector<2x64xf32>
    %63 = vector.broadcast %21 : vector<1x64xf32> to vector<16x64xf32>
    %64 = arith.addf %15, %63 : vector<16x64xf32>
    %cst_18 = arith.constant 0.000000e+00 : f32
    %65 = vector.broadcast %cst_18 : f32 to vector<16x64xf32>
    %66 = arith.maximumf %64, %65 : vector<16x64xf32>
    %cst_19 = arith.constant dense<0.000000e+00> : vector<2x128xf32>
    %67 = tpu.matmul %62, %16, %cst_19 {dimension_numbers = #tpu.dot_dimension_numbers<[1], [0], [0], [1], [0, 0, 1, 1], [], []>} : vector<2x64xf32>, vector<64x128xf32>, vector<2x128xf32> -> vector<2x128xf32>
    %68 = vector.broadcast %22 : vector<1x128xf32> to vector<2x128xf32>
    %69 = arith.addf %67, %68 : vector<2x128xf32>
    %c16 = arith.constant 16 : index
    %c0_20 = arith.constant 0 : index
    %70 = vector.load %arg4[%c16, %c0_20] : memref<24x128xf32, #tpu.memory_space<vmem>>, vector<2x128xf32>
    tpu.vector_store %arg4[%c16, %c0_20], %69 {strides = array<i32>} : memref<24x128xf32, #tpu.memory_space<vmem>>, vector<2x128xf32>,
    %71 = vector.extract_strided_slice %69 {offsets = [0, 0], sizes = [2, 8], strides = [1, 1]} : vector<2x128xf32> to vector<2x8xf32>
    %72 = tpu.iota {dimensions = array<i32: 1>} : vector<2x8xi32>
    %cst_21 = arith.constant dense<0xFF800000> : vector<2xf32>
    %73 = vector.multi_reduction <maximumf>, %71, %cst_21 [1] : vector<2x8xf32> to vector<2xf32>
    %74 = vector.shape_cast %73 : vector<2xf32> to vector<2x1xf32>
    %75 = vector.broadcast %74 : vector<2x1xf32> to vector<2x8xf32>
    %76 = arith.cmpf oeq, %71, %75 : vector<2x8xf32>
    %c8_i32_22 = arith.constant 8 : i32
    %77 = vector.broadcast %c8_i32_22 : i32 to vector<2x8xi32>
    %78 = arith.select %76, %72, %77 : vector<2x8xi1>, vector<2x8xi32>
    %cst_23 = arith.constant dense<2147483647> : vector<2xi32>
    %79 = vector.multi_reduction <minsi>, %78, %cst_23 [1] : vector<2x8xi32> to vector<2xi32>
    %80 = vector.shape_cast %79 : vector<2xi32> to vector<2x1xi32>
    %81 = vector.broadcast %80 : vector<2x1xi32> to vector<2x8xi32>
    %82 = arith.cmpi eq, %72, %81 : vector<2x8xi32>
    %83 = arith.extui %82 : vector<2x8xi1> to vector<2x8xi32>
    %84 = arith.sitofp %83 : vector<2x8xi32> to vector<2x8xf32>
    %cst_24 = arith.constant dense<0.000000e+00> : vector<2x128xf32>
    %85 = tpu.matmul %84, %18, %cst_24 {dimension_numbers = #tpu.dot_dimension_numbers<[1], [0], [0], [1], [0, 0, 1, 1], [], []>} : vector<2x8xf32>, vector<8x128xf32>, vector<2x128xf32> -> vector<2x128xf32>
    %86 = vector.shape_cast %85 : vector<2x128xf32> to vector<2x1x128xf32>
    %87 = vector.shape_cast %86 : vector<2x1x128xf32> to vector<2x1x128xf32>
    %88 = vector.broadcast %87 : vector<2x1x128xf32> to vector<2x8x128xf32>
    %89 = vector.shape_cast %88 : vector<2x8x128xf32> to vector<16x128xf32>
    %cst_25 = arith.constant dense<0.000000e+00> : vector<16x128xf32>
    %90 = tpu.matmul %66, %17, %cst_25 {dimension_numbers = #tpu.dot_dimension_numbers<[1], [0], [0], [1], [0, 0, 1, 1], [], []>} : vector<16x64xf32>, vector<64x128xf32>, vector<16x128xf32> -> vector<16x128xf32>
    %91 = arith.addf %90, %89 : vector<16x128xf32>
    %92 = vector.broadcast %23 : vector<1x128xf32> to vector<16x128xf32>
    %93 = arith.addf %91, %92 : vector<16x128xf32>
    %c0_26 = arith.constant 0 : index
    %c0_27 = arith.constant 0 : index
    %94 = vector.load %arg4[%c0_26, %c0_27] : memref<24x128xf32, #tpu.memory_space<vmem>>, vector<16x128xf32>
    tpu.vector_store %arg4[%c0_26, %c0_27], %93 {strides = array<i32>} : memref<24x128xf32, #tpu.memory_space<vmem>>, vector<16x128xf32>,
    return
  }
}

</mosaic_0001>

<bundles_post_ra>
// kernel: forward.1
= control target key start
LH: loop header
LB: loop body
LE: loop exit
PB: predicated region body
PF: predicated region fallthrough
CT: control target
= control target key end

     0   :  { %9 = vsyncpa [#allocation3], 0  ;;  %s850_s15 = smov [#allocation2]   ;;  %s1014_s0 = inlined_call_operand.vmem [shape: s32[16,1], index: 0, kind: input, shape index: {}]   ;;  %s1015_s1 = inlined_call_operand.vmem [shape: bf16[128,32], index: 1, kind: input, shape index: {}]   ;;  %s1016_s2 = inlined_call_operand.vmem [shape: bf16[32,256], index: 2, kind: input, shape index: {}]   ;;  %s1017_s3 = inlined_call_operand.hbm [shape: f32[144,128], index: 3, kind: input, shape index: {}]   ;;  %s1018_s4 = inlined_call_operand.vmem [shape: f32[24,128], index: 4, kind: output, shape index: {}]  }
   0x1   :  { %s21_s16 = sshll.u32 %s850_s15, 4  ;;  %s826_s19 = scalar_lea.hbm %s1017_s3, 2304  ;;  %s22_s16 = int_to_ptr.vmem [resolvable:$true] %s21_s16 }
   0x2   :  { %p827_p0 = scmp.ne.s32.totalorder %s1017_s3, %s826_s19  ;;  %p830_p1 = scmp.lt.u32.totalorder %s826_s19, %s1017_s3 }
   0x4   :  { %p832_p2 = pnand %p830_p1, %p827_p0 }
   0x6   :  { %835 = shalt.err (!%p832_p2)
}
   0x7   :  { %s836_s24 = scalar_lea.vmem %s22_s16, 2304  ;;  %p841_p4 = scmp.lt.s32.totalorder %s22_s16, %s22_s16 }
   0x8   :  { %p837_p3 = scmp.ne.s32.totalorder %s22_s16, %s836_s24  ;;  %p842_p5 = scmp.lt.s32.totalorder %s836_s24, %s836_s24 }
   0xa   :  { %p843_p6 = por %p842_p5, %p841_p4 }
   0xc   :  { %p844_p7 = pnand %p843_p6, %p837_p3 }
   0xe   :  { %847 = shalt.err (!%p844_p7)
}
   0xf   :  { %s851_s25 = smov 128   ;;  %s852_s26 = smov 8  }
  0x10   :  { %27 = dma.hbm_to_vmem [thread:$0]  %s1017_s3, 2304, %s22_s16, [#allocation3], %s851_s25, %s851_s25, %s852_s26  }
  0x11   :  { %848 = dma.done.wait [#allocation3], 2304  }
  0x12   :  { %849 = vsyncadd [#allocation3], 4294964992  ;;  %v853_v0 = vmov 0   ;;  %v854_v1 = vmov 0.0   ;;  %v32_v2 = vld [vmem:[%s1014_s0] sm:$0xff]  ;;  %v33_v4 = vld [vmem:[%s1014_s0 + $0x8] sm:$0xff]  ;;  %v34_v14 = vlaneseq }
  0x13   :  { %811 = vset.pattern.permute.xlu0 %v853_v0  ;;  %710 = vmatprep.subr.bf16.mxu0 %v854_v1  ;;  %v812_v3 = vld [vmem:[%s1015_s1] sm:$0xff]   ;;  %v813_v5 = vld [vmem:[%s1015_s1 + $0x8] sm:$0xff]   ;;  %vm855_vm0 = vmmov 0   ;;  %v814_v6 = vld [vmem:[%s1015_s1 + $0x10] sm:$0xff]   ;;  %v856_v18 = vmov 1.0|1.0  }
  0x14   :  { %215 = vmatprep.mubr.bf16.mxu1 %v853_v0  ;;  %37 = vperm.xlu0 %811, %v32_v2   ;;  %v820_v7 = vld [vmem:[%s1016_s2 + $0x4] ss:$8 sps:$4 sm:$0xff]   ;;  %v822_v8 = vld [vmem:[%s1016_s2] ss:$8 sps:$4 sm:$0xff]   ;;  %v815_v9 = vld [vmem:[%s1015_s1 + $0x18] sm:$0xff]   ;;  %v944_v16 = vand.u32 127, %v34_v14 }
  0x15   :  { %711 = vmatpush3.bf16.msra.mxu0 %v812_v3  ;;  %726 = vmatprep.mubr.msk.bf16.mxu0 %vm855_vm0, %v854_v1  ;;  %v816_v10 = vld [vmem:[%s1015_s1 + $0x20] sm:$0xff]   ;;  %v817_v11 = vld [vmem:[%s1015_s1 + $0x28] sm:$0xff]   ;;  %v818_v12 = vld [vmem:[%s1015_s1 + $0x30] sm:$0xff]   ;;  %vm179_vm4 = vcmask 261120   ;;  %v857_v29 = vmov 0.0|0.0   ;;  %v958_v33 = vshrl.u32 %v34_v14, 7 }
  0x16   :  { %712 = vmatprep.subr.bf16.mxu0 %v854_v1  ;;  %183 = vmatprep.subr.bf16.mxu1 %v820_v7  ;;  %v819_v13 = vld [vmem:[%s1015_s1 + $0x38] sm:$0xff]   ;;  %v226_v26 = vld [vmem:[#allocation2] sm:$0xff]  ;;  %v227_v27 = vld [vmem:[#allocation2 + $0x8] sm:$0xff]  ;;  %vm317_vm11 = vcmask 523264   ;;  %vm350_vm12 = vcmask 1041409   ;;  %vm425_vm13 = vcmask 58368  }
  0x17   :  { %184 = vmatpush1.bf16.msra.mxu1 %v822_v8  ;;  %v823_v19 = vld [vmem:[%s1016_s2 + $0x14] ss:$8 sps:$4 sm:$0xff]   ;;  %v825_v20 = vld [vmem:[%s1016_s2 + $0x10] ss:$8 sps:$4 sm:$0xff]   ;;  %v774_v28 = vpack.c.bf16 %v227_v27, %v226_v26  ;;  %v230_v35 = vld [vmem:[#allocation2 + $0x20] sm:$0xff]  ;;  %s858_s2 = smov 64  }
  0x18   :  { %40 = vperm.xlu0 %811, %v33_v4   ;;  %185 = vmatprep.subr.bf16.mxu1 %v823_v19  ;;  %v228_v30 = vld [vmem:[#allocation2 + $0x10] sm:$0xff]  ;;  %v229_v31 = vld [vmem:[#allocation2 + $0x18] sm:$0xff]  ;;  %v231_v36 = vld [vmem:[#allocation2 + $0x28] sm:$0xff]  ;;  %vm285_vm5 = vcmp.lt.s32.totalorder %v958_v33, 1  ;;  %vm290_vm6 = vcmp.lt.s32.totalorder %v958_v33, 7  ;;  %v251_v52 = vand.u32 7, %v958_v33 }
  0x19   :  { %713 = vmatpush3.bf16.msra.mxu0 %v813_v5  ;;  %v777_v32 = vpack.c.bf16 %v229_v31, %v228_v30  ;;  %v780_v42 = vpack.c.bf16 %v231_v36, %v230_v35  ;;  %v232_v45 = vld [vmem:[#allocation2 + $0x30] sm:$0xff]  ;;  %v233_v46 = vld [vmem:[#allocation2 + $0x38] sm:$0xff]  ;;  %v246_v53 = vadd.s32 8, %v958_v33  ;;  %v974_v56 = vsub.s32 0, %v958_v33  ;;  %v976_v57 = vld [vmem:[#allocation2 + $0x88] sm:$0xff] }
  0x1a   :  { %714 = vmatprep.subr.bf16.mxu0 %v854_v1  ;;  %v783_v51 = vpack.c.bf16 %v233_v46, %v232_v45  ;;  %vm271_vm7 = vcmp.gt.s32.totalorder %v251_v52, 0  ;;  %vm277_vm8 = vcmp.lt.s32.totalorder %v251_v52, 7  ;;  %v334_v36 = vsub.s32 1, %v958_v33  ;;  %v237_v52 = vld [vmem:[#allocation2 + $0x58] sm:$0xff] }
  0x1b   :  { %186 = vmatpush1.bf16.msra.mxu1 %v825_v20  ;;  %v258_v54 = vand.u32 7, %v246_v53  ;;  %v671_v55 = vsel %vm271_vm7, 1.0, %v854_v1  ;;  %v673_v58 = vsel %vm277_vm8, 1.0, %v854_v1  ;;  %v312_v62 = vrot.slane %v976_v57, %v974_v56 }
  0x1c   :  { %773 = vmatprep.subr.bf16.mxu1 %v857_v29 }
  0x1d   :  { %715 = vmatpush3.bf16.msra.mxu0 %v814_v6  ;;  %vm272_vm9 = vcmp.gt.s32.totalorder %v258_v54, 0  ;;  %vm278_vm10 = vcmp.lt.s32.totalorder %v258_v54, 7  ;;  %v238_v54 = vld [vmem:[#allocation2 + $0x60] sm:$0xff] }
  0x1e   :  { %716 = vmatprep.subr.bf16.mxu0 %v854_v1  ;;  %v672_v61 = vsel %vm272_vm9, 1.0, %v854_v1  ;;  %v674_v2 = vsel %vm278_vm10, 1.0, %v854_v1 }
  0x21   :  { %717 = vmatpush3.bf16.msra.mxu0 %v815_v9 }
  0x22   :  { %718 = vmatprep.subr.bf16.mxu0 %v854_v1 }
  0x25   :  { %719 = vmatpush3.bf16.msra.mxu0 %v816_v10 }
  0x26   :  { %720 = vmatprep.subr.bf16.mxu0 %v854_v1 }
  0x29   :  { %721 = vmatpush3.bf16.msra.mxu0 %v817_v11 }
  0x2a   :  { %722 = vmatprep.subr.bf16.mxu0 %v854_v1 }
  0x2d   :  { %723 = vmatpush3.bf16.msra.mxu0 %v818_v12 }
  0x2e   :  { %724 = vmatprep.subr.bf16.mxu0 %v854_v1 }
  0x31   :  { %725 = vmatpush3.bf16.msra.mxu0 %v819_v13 }
  0x32   :  { %749 = vmatprep.subr.mxu0 %v854_v1 }
  0x93   :  { %v38_v15 = vpop.permute.xlu0 %37 }
  0x94   :  { %vm42_vm1 = vcmp.eq.s32.totalorder %v944_v16, %v38_v15 }
  0x97   :  { %v41_v17 = vpop.permute.xlu0 %40 }
  0x98   :  { %vm43_vm2 = vcmp.eq.s32.totalorder %v944_v16, %v41_v17 }
  0x99   :  { %vm664_vm3 = vmpackc.low %vm43_vm2, %vm42_vm1 }
  0x9a   :  { %727 = vmatmul.mubr.msk.bf16.vlgmr.msra.gmra.mrb[0].mxu0 %vm664_vm3, %v856_v18 }
  0x9b   :  { %751 = vmatprep.mubr.msk.f32.mxu0 %vm855_vm0, %v854_v1 }
 0x16d   :  { %v147_v21 = vpop.f32.mrb[0].mxu0 }
 0x16e   :  { %v728_v22 = vpop.f32.mrb[1].mxu0 }
 0x16f   :  { %v150_v23 = vpop.f32.mrb[2].mxu0 }
 0x170   :  { %v154_v24 = vpack.c.bf16 %v150_v23, %v147_v21  ;;  %v729_v25 = vpop.f32.mrb[3].mxu0 }
 0x172   :  { %670 = vmatmul.mubr.msk.bf16.vlgmr.msra.gmra.mrb[0].mxu1 %vm179_vm4, %v154_v24 }
 0x173   :  { %746 = vmatprep.mubr.msk.f32.mxu1 %vm855_vm0, %v854_v1  ;;  %775 = vmatpush3.bf16.msra.mxu1 %v774_v28  ;;  %vm449_vm0 = vcmask 64512  }
 0x174   :  { %776 = vmatprep.subr.bf16.mxu1 %v857_v29 }
 0x177   :  { %778 = vmatpush3.bf16.msra.mxu1 %v777_v32 }
 0x178   :  { %779 = vmatprep.subr.bf16.mxu1 %v857_v29 }
 0x17b   :  { %781 = vmatpush3.bf16.msra.mxu1 %v780_v42 }
 0x17c   :  { %782 = vmatprep.subr.bf16.mxu1 %v857_v29  ;;  %v346_v29 = vsub.s32 2, %v958_v33 }
 0x17e   :  { %v347_v30 = vrot.slane %v976_v57, %v346_v29 }
 0x17f   :  { %784 = vmatpush3.bf16.msra.mxu1 %v783_v51 }
 0x245   :  { %v217_v34 = vpop.f32.mrb[0].mxu1 }
 0x246   :  { %297 = vrot.lane.b32.xlu1 %v217_v34, %s858_s2  ;;  %v961_v37 = vpop.f32.mrb[1].mxu1  ;;  %v283_v39 = vrot.slane %v217_v34, 7 }
 0x247   :  { %v221_v38 = vpop.f32.mrb[2].mxu1  ;;  %v288_v43 = vrot.slane %v961_v37, 1 }
 0x248   :  { %v284_v40 = vrot.slane %v221_v38, 7  ;;  %v964_v41 = vpop.f32.mrb[3].mxu1 }
 0x249   :  { %v289_v44 = vrot.slane %v964_v41, 1 }
 0x24a   :  { %299 = vrot.lane.b32.xlu1 %v221_v38, %s858_s2  ;;  %v287_v47 = vsel %vm285_vm5, %v284_v40, %v283_v39  ;;  %v286_v48 = vsel %vm285_vm5, %v283_v39, %v284_v40  ;;  %v335_v38 = vrot.slane %v976_v57, %v334_v36 }
 0x24b   :  { %v291_v49 = vsel %vm290_vm6, %v288_v43, %v289_v44  ;;  %v292_v50 = vsel %vm290_vm6, %v289_v44, %v288_v43  ;;  %v293_v59 = vmul.f32 %v671_v55, %v287_v47  ;;  %v294_v4 = vmul.f32 %v672_v61, %v286_v48  ;;  %v234_v48 = vld [vmem:[#allocation2 + $0x40] sm:$0xff]  ;;  %v239_v55 = vld [vmem:[#allocation2 + $0x68] sm:$0xff] }
 0x24c   :  { %v305_v0 = vmul.f32 %v673_v58, %v291_v49  ;;  %v306_v8 = vmul.f32 %v674_v2, %v292_v50  ;;  %v235_v49 = vld [vmem:[#allocation2 + $0x48] sm:$0xff]  ;;  %v236_v50 = vld [vmem:[#allocation2 + $0x50] sm:$0xff]  ;;  %v242_v58 = vld [vmem:[#allocation2 + $0x80] sm:$0xff] }
 0x24d   :  { %v785_v51 = vpack.c.bf16 %v235_v49, %v234_v48  ;;  %v789_v53 = vpack.c.bf16 %v237_v52, %v236_v50  ;;  %750 = vmatpush3.msra.mxu0 %v242_v58  ;;  %v241_v2 = vld [vmem:[#allocation2 + $0x78] sm:$0xff] }
 0x24f   :  { %786 = vmatprep.subr.bf16.mxu1 %v785_v51 }
 0x2b8   :  { %v298_v60 = vpop.permute.xlu1 %297 }
 0x2b9   :  { %v303_v63 = vadd.f32 %v298_v60, %v293_v59  ;;  %v793_v59 = vpack.c.bf16 %v239_v55, %v238_v54 }
 0x2bb   :  { %v307_v3 = vadd.f32 %v305_v0, %v303_v63  ;;  %v240_v0 = vld [vmem:[#allocation2 + $0x70] sm:$0xff] }
 0x2bc   :  { %v300_v5 = vpop.permute.xlu1 %299 }
 0x2bd   :  { %v313_v6 = vadd.f32 %v312_v62, %v307_v3  ;;  %v304_v7 = vadd.f32 %v300_v5, %v294_v4  ;;  %v797_v3 = vpack.c.bf16 %v241_v2, %v240_v0 }
 0x2bf   :  { %v315_v9 = vmax.f32 %v313_v6, 0.0  ;;  %v308_v10 = vadd.f32 %v306_v8, %v304_v7 }
 0x2c1   :  { %v314_v11 = vadd.f32 %v312_v62, %v308_v10  ;;  %v318_v12 = vsel %vm317_vm11, %v315_v9, -inf }
 0x2c2   :  { %v319_v13 = vrot.slane %v318_v12, 4 }
 0x2c3   :  { %v316_v14 = vmax.f32 %v314_v11, 0.0 }
 0x2c4   :  { %v320_v15 = vmax.f32 %v318_v12, %v319_v13  ;;  %v859_v12 = vmov 1966171168  }
 0x2c5   :  { %v325_v17 = vsel %vm317_vm11, %v316_v14, -inf  ;;  %v525_v13 = vunpack.c.l.s4 %v859_v12 }
 0x2c6   :  { %v321_v18 = vrot.slane %v320_v15, 2  ;;  %v326_v19 = vrot.slane %v325_v17, 4 }
 0x2c7   :  { %v526_v14 = vunpack.c.0.s8 %v525_v13 }
 0x2c8   :  { %v322_v20 = vmax.f32 %v320_v15, %v321_v18  ;;  %v327_v21 = vmax.f32 %v325_v17, %v326_v19 }
 0x2c9   :  { %v529_v15 = vsub.s32 %v526_v14, %v958_v33 }
 0x2ca   :  { %v328_v22 = vrot.slane %v327_v21, 2  ;;  %v323_v23 = vrot.slane %v322_v20, 1 }
 0x2cc   :  { %v329_v24 = vmax.f32 %v327_v21, %v328_v22  ;;  %v324_v26 = vmax.f32 %v322_v20, %v323_v23  ;;  %v643_v21 = vsub.s32 3, %v958_v33 }
 0x2ce   :  { %v330_v25 = vrot.slane %v329_v24, 1 }
 0x2d0   :  { %v331_v27 = vmax.f32 %v329_v24, %v330_v25  ;;  %v644_v25 = vrot.slane %v976_v57, %v643_v21 }
 0x2d2   :  { %v351_v28 = vsel %vm350_vm12, %v331_v27, %v324_v26 }
 0x2d3   :  { %747 = vmatmul.mubr.msk.f32.vlgmr.msra.gmra.mrb[4].mxu1 %vm317_vm11, %v351_v28 }
 0x2d4   :  { %788 = vmatpush3.bf16.msra.mxu1 %v785_v51 }
 0x2d5   :  { %790 = vmatprep.subr.bf16.mxu1 %v789_v53 }
 0x2d8   :  { %792 = vmatpush3.bf16.msra.mxu1 %v789_v53 }
 0x2d9   :  { %794 = vmatprep.subr.bf16.mxu1 %v793_v59 }
 0x2dc   :  { %796 = vmatpush3.bf16.msra.mxu1 %v793_v59 }
 0x2dd   :  { %798 = vmatprep.subr.bf16.mxu1 %v797_v3 }
 0x2e0   :  { %800 = vmatpush3.bf16.msra.mxu1 %v797_v3 }
 0x3a6   :  { %v420_v31 = vpop.f32.mrb[4].mxu1 }
 0x3a7   :  { %v421_v32 = vadd.f32 %v420_v31, %v347_v30  ;;  %v748_v34 = vpop.f32.mrb[5].mxu1 }
 0x3a9   :  { %424 = vst [vmem:[%s1018_s4 + $0x10] sm:$0x3] %v421_v32  ;;  %v426_v35 = vsel %vm425_vm13, %v421_v32, -inf }
 0x3aa   :  { %427 = vmax.xlane.f32.xlu0 %v426_v35 }
 0x3c0   :  { %337 = vrot.lane.b32.xlu0 %v335_v38, %s858_s2 }
 0x437   :  { %v428_v39 = vpop.xlane.xlu0 %427 }
 0x438   :  { %vm429_vm14 = vcmp.eq.f32.partialorder %v421_v32, %v428_v39 }
 0x439   :  { %v430_v40 = vsel %vm429_vm14, %v944_v16, 8 }
 0x43a   :  { %v431_v42 = vsel %vm425_vm13, %v430_v40, 2147483647 }
 0x43b   :  { %v338_v43 = vpop.permute.xlu0 %337  ;;  %v433_v44 = vshra.s32 %v431_v42, 16 }
 0x43c   :  { %v341_v45 = vadd.f32 %v338_v43, %v964_v41  ;;  %v432_v41 = vand.u32 65535, %v431_v42  ;;  %v340_v63 = vadd.f32 %v338_v43, %v961_v37 }
 0x43d   :  { %v435_v46 = vcvt.s32.f32 %v433_v44 }
 0x43e   :  { %v343_v47 = vmax.f32 %v341_v45, 0.0  ;;  %v434_v61 = vcvt.s32.f32 %v432_v41  ;;  %v342_v4 = vmax.f32 %v340_v63, 0.0 }
 0x43f   :  { %436 = vmin.xlane.f32.xlu1 %v435_v46 }
 0x440   :  { %560 = vrot.lane.b32.xlu0 %v343_v47, %s858_s2 }
 0x4b2   :  { %v561_v11 = vpop.permute.xlu0 %560 }
 0x4cc   :  { %v437_v60 = vpop.xlane.xlu1 %436 }
 0x4cd   :  { %vm438_vm15 = vcmp.eq.f32.partialorder %v435_v46, %v437_v60  ;;  %v443_v5 = vcvt.f32.s32 %v437_v60 }
 0x4ce   :  { %v439_v62 = vsel %vm438_vm15, %v434_v61, inf }
 0x4cf   :  { %440 = vmin.xlane.f32.xlu1 %v439_v62  ;;  %v444_v7 = vshll.u32 %v443_v5, 16 }
 0x4e0   :  { %558 = vrot.lane.b32.xlu1 %v342_v4, %s858_s2 }
 0x55c   :  { %v441_v6 = vpop.xlane.xlu1 %440 }
 0x55d   :  { %v442_v8 = vcvt.f32.s32 %v441_v6 }
 0x55f   :  { %v445_v9 = vadd.s32 %v444_v7, %v442_v8 }
 0x560   :  { %v559_v10 = vpop.permute.xlu1 %558 }
 0x561   :  { %vm446_vm1 = vcmp.eq.s32.totalorder %v944_v16, %v445_v9  ;;  %770 = vmatprep.mubr.msk.f32.mxu1 %vm317_vm11, %v559_v10 }
 0x562   :  { %v676_v37 = vsel %vm446_vm1, 1.0, %v854_v1  ;;  %771 = vmatmul.mubr.msk.f32.vlgmr.msra.gmra.mrb[6].mxu1 %vm317_vm11, %v561_v11 }
 0x563   :  { %752 = vmatmul.mubr.msk.f32.vlgmr.msra.gmra.mrb[4].mxu0 %vm449_vm0, %v676_v37 }
 0x635   :  { %v772_v17 = vpop.f32.mrb[6].mxu1 }
 0x636   :  { %v519_v18 = vpop.f32.mrb[4].mxu0  ;;  %v632_v19 = vpop.f32.mrb[7].mxu1 }
 0x637   :  { %v530_v20 = vrot.slane %v519_v18, %v529_v15  ;;  %v753_v22 = vpop.f32.mrb[5].mxu0 }
 0x639   :  { %v531_v16 = vcombine.high %v530_v20, %v530_v20  ;;  %v538_v23 = vrot.slane %v530_v20, %v529_v15 }
 0x63b   :  { %v545_v24 = vrot.slane %v531_v16, %v529_v15  ;;  %v549_v1 = vrot.slane %v538_v23, %v974_v56 }
 0x63d   :  { %v553_v26 = vrot.slane %v545_v24, %v974_v56  ;;  %v633_v27 = vadd.f32 %v632_v19, %v549_v1 }
 0x63f   :  { %v638_v28 = vadd.f32 %v772_v17, %v553_v26  ;;  %v645_v29 = vadd.f32 %v644_v25, %v633_v27 }
 0x641   :  { %v646_v30 = vadd.f32 %v644_v25, %v638_v28  ;;  %647 = vst [vmem:[%s1018_s4] sm:$0xff] %v645_v29 }
 0x643   :  { %648 = vst [vmem:[%s1018_s4 + $0x8] sm:$0xff] %v646_v30 }
 0x644   :  { %653 = vsyncpa [#allocation3], 1 }

</bundles_post_ra>
